<compile_context>
chip_gen: v6e
topology: v6e:2x2x1
jax: 0.10.0
libtpu: 0.0.40
codegen_flags: <defaults>
</compile_context>

<pallas_src>
import math
import functools

import jax
import jax.numpy as jnp
from jax.experimental import pallas as pl
from jax.experimental.pallas import tpu as pltpu


_INV_SQRT2 = 1.0 / math.sqrt(2.0)
_MIB = 1024 * 1024


def _ffn_kernel(x_ref, w1_ref, b1_ref, w2_ref, b2_ref, o_ref, acc_ref):
    """One (row-tile, hidden-slab) step of Linear -> GELU -> Linear."""
    k = pl.program_id(1)

    # First matmul: keep native dtype on the MXU, accumulate in f32.
    h = jnp.dot(x_ref[...], w1_ref[...], preferred_element_type=jnp.float32)
    # Bias + exact (erf-based) GELU in f32 (PyTorch nn.GELU() default).
    h = h + b1_ref[...].astype(jnp.float32)
    h = 0.5 * h * (1.0 + jax.lax.erf(h * jnp.float32(_INV_SQRT2)))
    # Dropout(p=0.0) is the identity -> elided.
    # TODO(synk): dropout with p > 0 (training mode) is not implemented here.

    # Second matmul: cast activations back to the weight dtype so bf16 models stay at
    # bf16 MXU rate; partial product over this hidden slab, accumulated in f32.
    part = jnp.dot(h.astype(w2_ref.dtype), w2_ref[...],
                   preferred_element_type=jnp.float32)

    # First slab writes the accumulator directly -> no zero-fill read-modify-write pass.
    @pl.when(k == 0)
    def _():
        acc_ref[...] = part

    @pl.when(k != 0)
    def _():
        acc_ref[...] += part

    @pl.when(k == pl.num_programs(1) - 1)
    def _():
        out = acc_ref[...] + b2_ref[...].astype(jnp.float32)
        o_ref[...] = out.astype(o_ref.dtype)


def _round_up(x, n):
    return ((x + n - 1) // n) * n


def _tpu_topology():
    """(vmem_capacity_bytes, tensorcores_per_chip) with conservative fallbacks."""
    cap = 128 * _MIB
    cores = 1
    try:
        info = pltpu.get_tpu_info()
        cap = int(getattr(info, "vmem_capacity_bytes", cap))
        cores = int(getattr(info, "num_cores",
                            getattr(info, "tensorcores_per_chip", 1)))
    except Exception:
        pass
    # v7x heuristic: 64 MiB VMEM per TensorCore, 2 TensorCores per chip.
    if cores <= 1 and cap <= 96 * _MIB:
        cores = 2
    return cap, cores


def _hidden_tile_candidates(hidden, hidden_tile):
    if hidden_tile is not None:
        assert hidden % hidden_tile == 0, "hidden_tile must evenly divide hidden_dim"
        return [hidden_tile]
    cands = [c for c in (1024, 512, 256, 128) if hidden % c == 0]
    if cands:
        return cands
    # hidden not divisible by 128: single full slab (equals full array dim -> legal).
    # TODO(synk): very large, non-128-divisible hidden sizes would need an extra pad.
    return [hidden]


def _row_tile_candidates(m, row_tile):
    if row_tile is not None:
        assert row_tile % 8 == 0, "row_tile must be a multiple of 8 (sublane)"
        return [min(row_tile, _round_up(m, 8))]
    tm_hi = min(2048, _round_up(m, 8))
    cands, t = [], 2048
    while t >= 8:
        if t <= tm_hi:
            cands.append(t)
        t //= 2
    if tm_hi not in cands:
        cands.insert(0, tm_hi)
    return cands


def _footprint_bytes(tm, th, dim, x_isz, w_isz):
    """Estimated VMEM footprint for one (tm, th) choice (double-buffered BlockSpecs)."""
    return (2 * tm * dim * x_isz            # x tiles
            + 2 * dim * th * w_isz          # W1 slabs
            + 2 * th * dim * w_isz          # W2 slabs
            + 2 * (th + dim) * w_isz        # bias slabs
            + 2 * tm * dim * x_isz          # output tiles
            + tm * dim * 4                  # f32 accumulator scratch
            + 2 * tm * th * 4)              # f32 GELU intermediate + temps


@functools.partial(jax.jit, static_argnames=("row_tile", "hidden_tile"))
def feed_forward(x, w1, b1, w2, b2, *, row_tile=None, hidden_tile=None):
    """x: (..., dim). Returns same shape/dtype as x."""
    dim = x.shape[-1]
    hidden = w1.shape[-1]
    lead_shape = x.shape[:-1]
    m = 1
    for s in lead_shape:
        m *= s
    x2d = x.reshape(m, dim)

    x_isz = jnp.dtype(x.dtype).itemsize
    w_isz = jnp.dtype(w1.dtype).itemsize

    # --- Chip-aware VMEM budget (v7x: 64 MiB/TC; v5e/v6e: 128 MiB).
    vmem_cap, n_cores = _tpu_topology()
    headroom = 8 * _MIB if vmem_cap <= 96 * _MIB else 16 * _MIB
    budget = vmem_cap - headroom

    # --- Joint (tm, th) selection: prefer the largest row tile (amortizes W1/W2
    #     re-streaming from HBM), then the largest hidden slab, that fits the budget.
    #     Very large `dim` is handled by this auto-shrink of tm rather than an N-tile.
    tm_cands = _row_tile_candidates(m, row_tile)
    th_cands = _hidden_tile_candidates(hidden, hidden_tile)
    tm, th = None, None
    for tm_c in tm_cands:
        for th_c in th_cands:
            if _footprint_bytes(tm_c, th_c, dim, x_isz, w_isz) <= budget:
                tm, th = tm_c, th_c
                break
        if tm is not None:
            break
    if tm is None:  # pathological shapes: take the smallest pair and let it ride
        tm, th = tm_cands[-1], th_cands[-1]

    # --- On 2-TensorCore chips, make sure the "parallel" axis has >= 2 row tiles.
    if row_tile is None and n_cores >= 2:
        while -(-m // tm) < 2 and tm > 8:
            tm = max(8, _round_up(tm // 2, 8))

    m_pad = _round_up(m, tm)
    if m_pad != m:
        x2d = jnp.pad(x2d, ((0, m_pad - m), (0, 0)))

    grid = (m_pad // tm, hidden // th)
    num_row_tiles = grid[0]

    b1_2d = b1.reshape(1, hidden)
    b2_2d = b2.reshape(1, dim)

    # --- Honest scoped-VMEM limit: based on the real footprint, clamped to capacity.
    footprint = _footprint_bytes(tm, th, dim, x_isz, w_isz)
    vmem_limit = int(min(max(int(footprint * 1.2), 32 * _MIB), budget))
    vmem_limit = max(vmem_limit, min(footprint + 2 * _MIB, budget))

    # --- Cost estimate including weight re-reads (once per row tile).
    cost = pl.CostEstimate(
        flops=4 * m_pad * dim * hidden,                      # two matmuls
        transcendentals=m_pad * hidden,                      # erf
        bytes_accessed=(2 * m_pad * dim * x_isz              # x in + out
                        + num_row_tiles * 2 * dim * hidden * w_isz   # W1 + W2 re-reads
                        + num_row_tiles * (hidden + dim) * w_isz),   # bias re-reads
    )

    out = pl.pallas_call(
        _ffn_kernel,
        out_shape=jax.ShapeDtypeStruct((m_pad, dim), x.dtype),
        grid_spec=pltpu.PrefetchScalarGridSpec(
            num_scalar_prefetch=0,
            grid=grid,
            in_specs=[
                pl.BlockSpec((tm, dim), lambda i, k: (i, 0)),   # x (resident over k)
                pl.BlockSpec((dim, th), lambda i, k: (0, k)),   # W1 hidden slab
                pl.BlockSpec((1, th), lambda i, k: (0, k)),     # b1 hidden slab
                pl.BlockSpec((th, dim), lambda i, k: (k, 0)),   # W2 hidden slab
                pl.BlockSpec((1, dim), lambda i, k: (0, 0)),    # b2
            ],
            out_specs=pl.BlockSpec((tm, dim), lambda i, k: (i, 0)),
            scratch_shapes=[pltpu.VMEM((tm, dim), jnp.float32)],
        ),
        compiler_params=pltpu.CompilerParams(
            dimension_semantics=("parallel", "arbitrary"),
            vmem_limit_bytes=vmem_limit,
        ),
        cost_estimate=cost,
    )(x2d, w1, b1_2d, w2, b2_2d)

    if m_pad != m:
        out = out[:m]
    return out.reshape(*lead_shape, dim)


def init_params(key, dim, hidden_dim, dtype=jnp.float32):
    """Deterministic init mirroring nn.Linear default (uniform +-1/sqrt(fan_in))."""
    k1, k2, k3, k4 = jax.random.split(key, 4)
    lim1 = 1.0 / math.sqrt(dim)
    lim2 = 1.0 / math.sqrt(hidden_dim)
    w1 = jax.random.uniform(k1, (dim, hidden_dim), dtype, -lim1, lim1)
    b1 = jax.random.uniform(k2, (hidden_dim,), dtype, -lim1, lim1)
    w2 = jax.random.uniform(k3, (hidden_dim, dim), dtype, -lim2, lim2)
    b2 = jax.random.uniform(k4, (dim,), dtype, -lim2, lim2)
    return w1, b1, w2, b2


def _reference(x, w1, b1, w2, b2):
    h = x @ w1 + b1
    h = 0.5 * h * (1.0 + jax.lax.erf(h / jnp.sqrt(2.0)))
    return h @ w2 + b2


if __name__ == "__main__":
    batch, seq, dim, hidden_dim = 2, 8, 32, 64

    key = jax.random.PRNGKey(0)
    kx, kp = jax.random.split(key)
    x = jax.random.normal(kx, (batch, seq, dim), dtype=jnp.float32)
    w1, b1, w2, b2 = init_params(kp, dim, hidden_dim)

    out = feed_forward(x, w1, b1, w2, b2)
    out = jax.block_until_ready(out)

    ref = _reference(x, w1, b1, w2, b2)
    assert out.shape == x.shape and out.dtype == x.dtype
    assert jnp.allclose(out, ref, atol=2e-5, rtol=2e-5), "mismatch vs reference"

    print("KERNEL_OK")
</pallas_src>

<mosaic_0001>
module attributes {stable_mosaic.version = 11 : i64} {
  func.func @_ffn_kernel(%arg0: i32, %arg1: i32, %arg2: memref<16x32xf32, #tpu.memory_space<vmem>>, %arg3: memref<32x64xf32, #tpu.memory_space<vmem>>, %arg4: memref<1x64xf32, #tpu.memory_space<vmem>>, %arg5: memref<64x32xf32, #tpu.memory_space<vmem>>, %arg6: memref<1x32xf32, #tpu.memory_space<vmem>>, %arg7: memref<16x32xf32, #tpu.memory_space<vmem>>, %arg8: memref<16x32xf32, #tpu.memory_space<vmem>>) attributes {dimension_semantics = [#tpu.dimension_semantics<parallel>, #tpu.dimension_semantics<arbitrary>], iteration_bounds = array<i64: 1, 1>, scalar_prefetch = 0 : i64, scratch_operands = 1 : i64, tpu.core_type = #tpu.core_type<tc>, window_params = [{transform_indices = @transform_0, window_bounds = array<i64: 16, 32>}, {transform_indices = @transform_1, window_bounds = array<i64: 32, 64>}, {transform_indices = @transform_2, window_bounds = array<i64: 1, 64>}, {transform_indices = @transform_3, window_bounds = array<i64: 64, 32>}, {pipeline_mode = #tpu.pipeline_mode<synchronous>, transform_indices = @transform_4, window_bounds = array<i64: 1, 32>}, {transform_indices = @transform_5, window_bounds = array<i64: 16, 32>}]} {
    %c0 = arith.constant 0 : index
    %c0_0 = arith.constant 0 : index
    %0 = vector.load %arg2[%c0, %c0_0] : memref<16x32xf32, #tpu.memory_space<vmem>>, vector<16x32xf32>
    %c0_1 = arith.constant 0 : index
    %c0_2 = arith.constant 0 : index
    %1 = vector.load %arg3[%c0_1, %c0_2] : memref<32x64xf32, #tpu.memory_space<vmem>>, vector<32x64xf32>
    %cst = arith.constant dense<0.000000e+00> : vector<16x64xf32>
    %2 = tpu.matmul %0, %1, %cst {dimension_numbers = #tpu.dot_dimension_numbers<[1], [0], [0], [1], [0, 0, 1, 1], [], []>} : vector<16x32xf32>, vector<32x64xf32>, vector<16x64xf32> -> vector<16x64xf32>
    %c0_3 = arith.constant 0 : index
    %c0_4 = arith.constant 0 : index
    %3 = vector.load %arg4[%c0_3, %c0_4] : memref<1x64xf32, #tpu.memory_space<vmem>>, vector<1x64xf32>
    %4 = vector.broadcast %3 : vector<1x64xf32> to vector<16x64xf32>
    %5 = arith.addf %2, %4 : vector<16x64xf32>
    %cst_5 = arith.constant 5.000000e-01 : f32
    %6 = vector.broadcast %cst_5 : f32 to vector<16x64xf32>
    %7 = arith.mulf %6, %5 : vector<16x64xf32>
    %cst_6 = arith.constant 0.707106769 : f32
    %8 = vector.broadcast %cst_6 : f32 to vector<16x64xf32>
    %9 = arith.mulf %5, %8 : vector<16x64xf32>
    %10 = math.erf %9 : vector<16x64xf32>
    %cst_7 = arith.constant 1.000000e+00 : f32
    %11 = vector.broadcast %cst_7 : f32 to vector<16x64xf32>
    %12 = arith.addf %11, %10 : vector<16x64xf32>
    %13 = arith.mulf %7, %12 : vector<16x64xf32>
    %c0_8 = arith.constant 0 : index
    %c0_9 = arith.constant 0 : index
    %14 = vector.load %arg5[%c0_8, %c0_9] : memref<64x32xf32, #tpu.memory_space<vmem>>, vector<64x32xf32>
    %cst_10 = arith.constant dense<0.000000e+00> : vector<16x32xf32>
    %15 = tpu.matmul %13, %14, %cst_10 {dimension_numbers = #tpu.dot_dimension_numbers<[1], [0], [0], [1], [0, 0, 1, 1], [], []>} : vector<16x64xf32>, vector<64x32xf32>, vector<16x32xf32> -> vector<16x32xf32>
    %c0_i32 = arith.constant 0 : i32
    %16 = arith.cmpi eq, %arg1, %c0_i32 : i32
    %17 = arith.extui %16 : i1 to i32
    %c0_i32_11 = arith.constant 0 : i32
    %18 = arith.cmpi ne, %17, %c0_i32_11 : i32
    scf.if %18 {
      %c0_16 = arith.constant 0 : index
      %c0_17 = arith.constant 0 : index
      %25 = vector.load %arg8[%c0_16, %c0_17] : memref<16x32xf32, #tpu.memory_space<vmem>>, vector<16x32xf32>
      tpu.vector_store %arg8[%c0_16, %c0_17], %15 {strides = array<i32>} : memref<16x32xf32, #tpu.memory_space<vmem>>, vector<16x32xf32>,
    } else {
    }
    %c0_i32_12 = arith.constant 0 : i32
    %19 = arith.cmpi ne, %arg1, %c0_i32_12 : i32
    %20 = arith.extui %19 : i1 to i32
    %c0_i32_13 = arith.constant 0 : i32
    %21 = arith.cmpi ne, %20, %c0_i32_13 : i32
    scf.if %21 {
      %c0_16 = arith.constant 0 : index
      %c0_17 = arith.constant 0 : index
      %25 = vector.load %arg8[%c0_16, %c0_17] : memref<16x32xf32, #tpu.memory_space<vmem>>, vector<16x32xf32>
      %26 = arith.addf %25, %15 : vector<16x32xf32>
      %c0_18 = arith.constant 0 : index
      %c0_19 = arith.constant 0 : index
      %27 = vector.load %arg8[%c0_18, %c0_19] : memref<16x32xf32, #tpu.memory_space<vmem>>, vector<16x32xf32>
      tpu.vector_store %arg8[%c0_18, %c0_19], %26 {strides = array<i32>} : memref<16x32xf32, #tpu.memory_space<vmem>>, vector<16x32xf32>,
    } else {
    }
    %c0_i32_14 = arith.constant 0 : i32
    %22 = arith.cmpi eq, %arg1, %c0_i32_14 : i32
    %23 = arith.extui %22 : i1 to i32
    %c0_i32_15 = arith.constant 0 : i32
    %24 = arith.cmpi ne, %23, %c0_i32_15 : i32
    scf.if %24 {
      %c0_16 = arith.constant 0 : index
      %c0_17 = arith.constant 0 : index
      %25 = vector.load %arg8[%c0_16, %c0_17] : memref<16x32xf32, #tpu.memory_space<vmem>>, vector<16x32xf32>
      %c0_18 = arith.constant 0 : index
      %c0_19 = arith.constant 0 : index
      %26 = vector.load %arg6[%c0_18, %c0_19] : memref<1x32xf32, #tpu.memory_space<vmem>>, vector<1x32xf32>
      %27 = vector.broadcast %26 : vector<1x32xf32> to vector<16x32xf32>
      %28 = arith.addf %25, %27 : vector<16x32xf32>
      %c0_20 = arith.constant 0 : index
      %c0_21 = arith.constant 0 : index
      %29 = vector.load %arg7[%c0_20, %c0_21] : memref<16x32xf32, #tpu.memory_space<vmem>>, vector<16x32xf32>
      tpu.vector_store %arg7[%c0_20, %c0_21], %28 {strides = array<i32>} : memref<16x32xf32, #tpu.memory_space<vmem>>, vector<16x32xf32>,
    } else {
    }
    return
  }
  func.func @transform_0(%arg0: i32, %arg1: i32) -> (i32, i32) {
    %c0_i32 = arith.constant 0 : i32
    %c0_i32_0 = arith.constant 0 : i32
    return %arg0, %c0_i32 : i32, i32
  }
  func.func @transform_1(%arg0: i32, %arg1: i32) -> (i32, i32) {
    %c0_i32 = arith.constant 0 : i32
    %c0_i32_0 = arith.constant 0 : i32
    return %c0_i32, %arg1 : i32, i32
  }
  func.func @transform_2(%arg0: i32, %arg1: i32) -> (i32, i32) {
    %c0_i32 = arith.constant 0 : i32
    %c0_i32_0 = arith.constant 0 : i32
    return %c0_i32, %arg1 : i32, i32
  }
  func.func @transform_3(%arg0: i32, %arg1: i32) -> (i32, i32) {
    %c0_i32 = arith.constant 0 : i32
    %c0_i32_0 = arith.constant 0 : i32
    return %arg1, %c0_i32 : i32, i32
  }
  func.func @transform_4(%arg0: i32, %arg1: i32) -> (i32, i32) {
    %c0_i32 = arith.constant 0 : i32
    %c0_i32_0 = arith.constant 0 : i32
    %c0_i32_1 = arith.constant 0 : i32
    return %c0_i32, %c0_i32_0 : i32, i32
  }
  func.func @transform_5(%arg0: i32, %arg1: i32) -> (i32, i32) {
    %c0_i32 = arith.constant 0 : i32
    %c0_i32_0 = arith.constant 0 : i32
    return %arg0, %c0_i32 : i32, i32
  }
}

</mosaic_0001>

<bundles_post_ra>
// kernel: feed_forward.1
= control target key start
LH: loop header
LB: loop body
LE: loop exit
PB: predicated region body
PF: predicated region fallthrough
CT: control target
= control target key end

     0   :  { %vm34_vm0 = vcmask 261120   ;;  %s435_s0 = inlined_call_operand.vmem [shape: f32[16,32], index: 0, kind: input, shape index: {}]   ;;  %s436_s1 = inlined_call_operand.vmem [shape: f32[32,64], index: 1, kind: input, shape index: {}]   ;;  %s437_s2 = inlined_call_operand.vmem [shape: f32[1,64], index: 2, kind: input, shape index: {}]   ;;  %s438_s3 = inlined_call_operand.vmem [shape: f32[64,32], index: 3, kind: input, shape index: {}]   ;;  %s439_s4 = inlined_call_operand.vmem [shape: f32[1,32], index: 4, kind: input, shape index: {}]   ;;  %s440_s5 = inlined_call_operand.hbm [shape: f32[16,32], index: 5, kind: output, shape index: {}]  }
   0x1   :  { %v26_v0 = vld [vmem:[%s436_s1 + $0x18] sm:$0xff]  ;;  %v25_v1 = vld [vmem:[%s436_s1 + $0x10] sm:$0xff]  ;;  %v21_v2 = vld [vmem:[%s435_s0] sm:$0xff] }
   0x2   :  { %286 = vmatprep.subr.mxu0 %v26_v0  ;;  %v24_v3 = vld [vmem:[%s436_s1 + $0x8] sm:$0xff]  ;;  %294 = vmatprep.mubr.msk.f32.mxu0 %vm34_vm0, %v21_v2 }
   0x3   :  { %287 = vmatpush3.msra.mxu0 %v26_v0 }
   0x4   :  { %10 = vsyncpa [#allocation4], 0  ;;  %288 = vmatprep.subr.mxu0 %v25_v1  ;;  %v23_v4 = vld [vmem:[%s436_s1] sm:$0xff]  ;;  %v22_v5 = vld [vmem:[%s435_s0 + $0x8] sm:$0xff]  ;;  %vm134_vm1 = vcmask 523264   ;;  %s345_s21 = smov [#allocation3]  }
   0x5   :  { %289 = vmatpush3.msra.mxu0 %v25_v1  ;;  %v133_v6 = vld [vmem:[%s438_s3 + $0x38] sm:$0xff]  ;;  %v132_v7 = vld [vmem:[%s438_s3 + $0x30] sm:$0xff]  ;;  %v131_v8 = vld [vmem:[%s438_s3 + $0x28] sm:$0xff]  ;;  %s253_s22 = sshll.u32 %s345_s21, 4  ;;  %s254_s22 = int_to_ptr.vmem [resolvable:$true] %s253_s22 }
   0x6   :  { %290 = vmatprep.subr.mxu0 %v24_v3  ;;  %297 = vmatprep.subr.mxu1 %v133_v6  ;;  %v130_v9 = vld [vmem:[%s438_s3 + $0x20] sm:$0xff]  ;;  %v129_v10 = vld [vmem:[%s438_s3 + $0x18] sm:$0xff]  ;;  %v128_v11 = vld [vmem:[%s438_s3 + $0x10] sm:$0xff]  ;;  %s323_s23 = scalar_lea.vmem %s254_s22, 256  ;;  %p328_p1 = scmp.lt.s32.totalorder %s254_s22, %s254_s22 }
   0x7   :  { %291 = vmatpush3.msra.mxu0 %v24_v3  ;;  %298 = vmatpush3.msra.mxu1 %v133_v6  ;;  %v127_v12 = vld [vmem:[%s438_s3 + $0x8] sm:$0xff]  ;;  %v126_v13 = vld [vmem:[%s438_s3] sm:$0xff]  ;;  %p324_p0 = scmp.ne.s32.totalorder %s254_s22, %s323_s23  ;;  %p329_p2 = scmp.lt.s32.totalorder %s323_s23, %s323_s23 }
   0x8   :  { %292 = vmatprep.subr.mxu0 %v23_v4  ;;  %299 = vmatprep.subr.mxu1 %v132_v7  ;;  %v264_v14 = vld [vmem:[%s437_s2] ss:$0 sm:$0xff] }
   0x9   :  { %293 = vmatpush3.msra.mxu0 %v23_v4  ;;  %300 = vmatpush3.msra.mxu1 %v132_v7  ;;  %v269_v31 = vld [vmem:[%s439_s4] ss:$0 sm:$0xff]  ;;  %p330_p3 = por %p329_p2, %p328_p1 }
   0xa   :  { %295 = vmatmul.mubr.msk.f32.vlgmr.msra.gmra.mxu0 %vm34_vm0, %v22_v5  ;;  %301 = vmatprep.subr.mxu1 %v131_v8 }
   0xb   :  { %302 = vmatpush3.msra.mxu1 %v131_v8  ;;  %p331_p4 = pnand %p330_p3, %p324_p0 }
   0xc   :  { %303 = vmatprep.subr.mxu1 %v130_v9 }
   0xd   :  { %304 = vmatpush3.msra.mxu1 %v130_v9 }
   0xe   :  { %305 = vmatprep.subr.mxu1 %v129_v10 }
   0xf   :  { %306 = vmatpush3.msra.mxu1 %v129_v10 }
  0x10   :  { %307 = vmatprep.subr.mxu1 %v128_v11 }
  0x11   :  { %308 = vmatpush3.msra.mxu1 %v128_v11 }
  0x12   :  { %309 = vmatprep.subr.mxu1 %v127_v12 }
  0x13   :  { %310 = vmatpush3.msra.mxu1 %v127_v12 }
  0x14   :  { %311 = vmatprep.subr.mxu1 %v126_v13 }
  0x15   :  { %312 = vmatpush3.msra.mxu1 %v126_v13 }
  0xca   :  { %v296_v15 = vpop.f32.mrf.mxu0 }
  0xcb   :  { %v113_v16 = vadd.f32 %v296_v15, %v264_v14 }
  0xcc   :  { %v107_v17 = vpop.f32.mrf.mxu0 }
  0xcd   :  { %v119_v18 = vmul.f32 0.70710677, %v113_v16  ;;  %v108_v19 = vadd.f32 %v264_v14, %v107_v17  ;;  %v117_v26 = vmul.f32 0.5, %v113_v16 }
  0xcf   :  { %319 = verf.f32 %v119_v18  ;;  %v118_v20 = vmul.f32 0.70710677, %v108_v19  ;;  %v116_v24 = vmul.f32 0.5, %v108_v19 }
  0xd1   :  { %321 = verf.f32 %v118_v20 }
  0xdc   :  { %v320_v21 = vpop.eup %319 }
  0xdd   :  { %v123_v23 = vadd.f32 1.0, %v320_v21 }
  0xde   :  { %v322_v22 = vpop.eup %321 }
  0xdf   :  { %v122_v25 = vadd.f32 1.0, %v322_v22  ;;  %v125_v28 = vmul.f32 %v123_v23, %v117_v26 }
  0xe1   :  { %v124_v27 = vmul.f32 %v122_v25, %v116_v24 }
  0xe3   :  { %313 = vmatprep.mubr.msk.f32.mxu1 %vm134_vm1, %v124_v27 }
  0xe4   :  { %314 = vmatmul.mubr.msk.f32.vlgmr.msra.gmra.mxu1 %vm134_vm1, %v125_v28 }
 0x1a4   :  { %v315_v29 = vpop.f32.mrf.mxu1 }
 0x1a5   :  { %221 = vst.msk [vmem:[#allocation2 + $0x8] sm:$0xff] %vm34_vm0, %v315_v29 }
 0x1a6   :  { %v207_v30 = vpop.f32.mrf.mxu1 }
 0x1a7   :  { %220 = vst.msk [vmem:[#allocation2] sm:$0xff] %vm34_vm0, %v207_v30 }
 0x1ac   :  { %v236_v32 = vld [vmem:[#allocation2 + $0x8] sm:$0xff] }
 0x1ad   :  { %v245_v33 = vadd.f32 %v269_v31, %v236_v32 }
 0x1ae   :  { %v235_v34 = vld [vmem:[#allocation2] sm:$0xff] }
 0x1af   :  { %v244_v35 = vadd.f32 %v269_v31, %v235_v34  ;;  %247 = vst.msk [vmem:[#allocation3 + $0x8] sm:$0xff] %vm34_vm0, %v245_v33 }
 0x1b1   :  { %246 = vst.msk [vmem:[#allocation3] sm:$0xff] %vm34_vm0, %v244_v35 }
 0x1b2   :  { %334 = shalt.err (!%p331_p4)
}
 0x1b3   :  { %s346_s24 = smov 128   ;;  %s347_s4 = smov 8  }
 0x1b4   :  { %259 = dma.vmem_to_hbm [thread:$0]  %s254_s22, 256, %s440_s5, [#allocation4], %s346_s24, %s346_s24, %s347_s4  }
 0x1b5   :  { %343 = dma.done.wait [#allocation4], 256  }
 0x1b6   :  { %344 = vsyncadd [#allocation4], 4294967040 }
 0x1b7   :  { %263 = vsyncpa [#allocation4], 1 }

</bundles_post_ra>
